<compile_context>
chip_gen: v5e
topology: v5e:2x2
jax: 0.10.0
libtpu: 0.0.40
codegen_flags: <defaults>
</compile_context>

<pallas_src>
import functools

import jax
import jax.numpy as jnp
from jax import lax
from jax.experimental import pallas as pl
from jax.experimental.pallas import tpu as pltpu


def _round_up(x, m):
    return ((x + m - 1) // m) * m


def _ova_loss_kernel(x_ref, lab_ref, pos_ref, neg_ref, *, C):
    # x_ref:  (TB, 2*C) row-major flatten of (TB, 2, C); lanes [0, C) hold the
    #         class-0 logits, lanes [C, 2C) the class-1 logits.
    # lab_ref: (TB, 1) int32 labels.
    # pos_ref / neg_ref: (TB, 1) per-row partial results.
    v = x_ref[...].astype(jnp.float32)
    x0 = v[:, :C]
    x1 = v[:, C:]

    # 2-way softmax over the pair is a function of the logit difference only:
    #   p0 = sigmoid(d), p1 = sigmoid(-d), d = x0 - x1.
    # Share one exp and one reciprocal; keep the module's exact +1e-8 epsilon.
    d = x0 - x1
    e = jnp.exp(-jnp.abs(d))                       # in (0, 1], never overflows
    r = 1.0 / (1.0 + e)
    p_large = r                                    # sigmoid(|d|)
    p_small = e * r                                # sigmoid(-|d|)
    nlog_large = -jnp.log(p_large + 1e-8)
    nlog_small = -jnp.log(p_small + 1e-8)
    d_pos = d >= 0.0
    nlogp0 = jnp.where(d_pos, nlog_large, nlog_small)   # -log(p0 + eps)
    nlogp1 = jnp.where(d_pos, nlog_small, nlog_large)   # -log(p1 + eps)

    tb = d.shape[0]
    lab = lab_ref[...]                                    # (TB, 1) int32
    col = lax.broadcasted_iota(jnp.int32, (tb, C), 1)
    is_label = col == lab                                 # fused one-hot mask

    pos_ref[...] = jnp.sum(jnp.where(is_label, nlogp1, 0.0),
                           axis=1, keepdims=True)
    neg_ref[...] = jnp.max(jnp.where(is_label, 0.0, nlogp0),
                           axis=1, keepdims=True)


def ova_loss(x, label):
    """x: (B, 2, C) float, label: (B,) int -> scalar float32 loss."""
    B, two, C = x.shape
    assert two == 2

    # Free contiguous reshape -> lane-dense plane; no wrapper-side copies of
    # the logits, so the kernel's DMA is the only HBM read of the input.
    xf = x.reshape(B, 2 * C)
    lab = label.astype(jnp.int32).reshape(B, 1)

    # Batch tile: multiple of 8 sublanes; keep double-buffered input blocks
    # within ~8 MiB of VMEM (safe on v5e/v6e 32 MiB scoped and v7x 64 MiB).
    itemsize = jnp.dtype(x.dtype).itemsize
    bytes_per_row = 2 * C * itemsize * 2            # one block row x 2 buffers
    tb_cap = max(8, ((8 * 1024 * 1024) // max(bytes_per_row, 1)) // 8 * 8)
    tb = min(min(tb_cap, 1024), _round_up(B, 8))

    b_pad = _round_up(B, tb)
    if b_pad != B:
        pad = b_pad - B
        xf = jnp.pad(xf, ((0, pad), (0, 0)))
        lab = jnp.pad(lab, ((0, pad), (0, 0)))

    grid = (b_pad // tb,)
    kernel = functools.partial(_ova_loss_kernel, C=C)
    pos_per, neg_per = pl.pallas_call(
        kernel,
        out_shape=(jax.ShapeDtypeStruct((b_pad, 1), jnp.float32),
                   jax.ShapeDtypeStruct((b_pad, 1), jnp.float32)),
        grid=grid,
        in_specs=[
            pl.BlockSpec((tb, 2 * C), lambda i: (i, 0)),
            pl.BlockSpec((tb, 1), lambda i: (i, 0)),
        ],
        out_specs=(
            pl.BlockSpec((tb, 1), lambda i: (i, 0)),
            pl.BlockSpec((tb, 1), lambda i: (i, 0)),
        ),
        compiler_params=pltpu.CompilerParams(
            dimension_semantics=("parallel",),
            vmem_limit_bytes=32 * 1024 * 1024,
        ),
    )(xf, lab)

    # Tiny final reduction in the wrapper (drops padded rows).
    pos = jnp.sum(pos_per[:B, 0]) / B
    neg = jnp.sum(neg_per[:B, 0]) / B
    return 0.5 * (pos + neg)


def _ova_loss_ref(x, label):
    # Plain-JAX reference matching the PyTorch module (with its +1e-8 eps).
    p = jax.nn.softmax(x.astype(jnp.float32), axis=1)
    _, _, C = x.shape
    label_p = jax.nn.one_hot(label, C, dtype=jnp.float32)
    label_n = 1.0 - label_p
    pos = jnp.mean(jnp.sum(-jnp.log(p[:, 1, :] + 1e-8) * label_p, axis=1))
    neg = jnp.mean(jnp.max(-jnp.log(p[:, 0, :] + 1e-8) * label_n, axis=1))
    return 0.5 * (pos + neg)


if __name__ == "__main__":
    key = jax.random.PRNGKey(0)
    kx, kl = jax.random.split(key)

    B, C = 4, 16
    x = jax.random.normal(kx, (B, 2, C), dtype=jnp.float32)
    label = jax.random.randint(kl, (B,), 0, C, dtype=jnp.int32)

    loss = ova_loss(x, label)
    jax.block_until_ready(loss)

    ref = _ova_loss_ref(x, label)
    assert jnp.allclose(loss, ref, atol=1e-5, rtol=1e-5), (loss, ref)

    print("KERNEL_OK")
</pallas_src>

<mosaic_0001>
module attributes {stable_mosaic.version = 11 : i64} {
  func.func @_ova_loss_kernel(%arg0: i32, %arg1: memref<8x32xf32, #tpu.memory_space<vmem>>, %arg2: memref<8x1xi32, #tpu.memory_space<vmem>>, %arg3: memref<8x1xf32, #tpu.memory_space<vmem>>, %arg4: memref<8x1xf32, #tpu.memory_space<vmem>>) attributes {dimension_semantics = [#tpu.dimension_semantics<parallel>], iteration_bounds = array<i64: 1>, scalar_prefetch = 0 : i64, scratch_operands = 0 : i64, tpu.core_type = #tpu.core_type<tc>, window_params = [{transform_indices = @transform_0, window_bounds = array<i64: 8, 32>}, {transform_indices = @transform_1, window_bounds = array<i64: 8, 1>}, {transform_indices = @transform_2, window_bounds = array<i64: 8, 1>}, {transform_indices = @transform_3, window_bounds = array<i64: 8, 1>}]} {
    %c0 = arith.constant 0 : index
    %c0_0 = arith.constant 0 : index
    %0 = vector.load %arg1[%c0, %c0_0] : memref<8x32xf32, #tpu.memory_space<vmem>>, vector<8x32xf32>
    %1 = vector.extract_strided_slice %0 {offsets = [0, 0], sizes = [8, 16], strides = [1, 1]} : vector<8x32xf32> to vector<8x16xf32>
    %2 = vector.extract_strided_slice %0 {offsets = [0, 16], sizes = [8, 16], strides = [1, 1]} : vector<8x32xf32> to vector<8x16xf32>
    %3 = arith.subf %1, %2 : vector<8x16xf32>
    %4 = math.absf %3 : vector<8x16xf32>
    %cst = arith.constant 0.000000e+00 : f32
    %5 = vector.broadcast %cst : f32 to vector<8x16xf32>
    %6 = arith.subf %5, %4 : vector<8x16xf32>
    %7 = math.exp %6 : vector<8x16xf32>
    %cst_1 = arith.constant 1.000000e+00 : f32
    %8 = vector.broadcast %cst_1 : f32 to vector<8x16xf32>
    %9 = arith.addf %8, %7 : vector<8x16xf32>
    %cst_2 = arith.constant 1.000000e+00 : f32
    %10 = vector.broadcast %cst_2 : f32 to vector<8x16xf32>
    %11 = arith.divf %10, %9 : vector<8x16xf32>
    %12 = arith.mulf %7, %11 : vector<8x16xf32>
    %cst_3 = arith.constant 9.99999993E-9 : f32
    %13 = vector.broadcast %cst_3 : f32 to vector<8x16xf32>
    %14 = arith.addf %11, %13 : vector<8x16xf32>
    %15 = math.log %14 : vector<8x16xf32>
    %cst_4 = arith.constant 0.000000e+00 : f32
    %16 = vector.broadcast %cst_4 : f32 to vector<8x16xf32>
    %17 = arith.subf %16, %15 : vector<8x16xf32>
    %cst_5 = arith.constant 9.99999993E-9 : f32
    %18 = vector.broadcast %cst_5 : f32 to vector<8x16xf32>
    %19 = arith.addf %12, %18 : vector<8x16xf32>
    %20 = math.log %19 : vector<8x16xf32>
    %cst_6 = arith.constant 0.000000e+00 : f32
    %21 = vector.broadcast %cst_6 : f32 to vector<8x16xf32>
    %22 = arith.subf %21, %20 : vector<8x16xf32>
    %cst_7 = arith.constant 0.000000e+00 : f32
    %23 = vector.broadcast %cst_7 : f32 to vector<8x16xf32>
    %24 = arith.cmpf oge, %3, %23 : vector<8x16xf32>
    %25 = arith.select %24, %17, %22 : vector<8x16xi1>, vector<8x16xf32>
    %26 = arith.select %24, %22, %17 : vector<8x16xi1>, vector<8x16xf32>
    %c0_8 = arith.constant 0 : index
    %c0_9 = arith.constant 0 : index
    %27 = vector.load %arg2[%c0_8, %c0_9] : memref<8x1xi32, #tpu.memory_space<vmem>>, vector<8x1xi32>
    %28 = tpu.iota {dimensions = array<i32: 1>} : vector<8x16xi32>
    %29 = vector.broadcast %27 : vector<8x1xi32> to vector<8x16xi32>
    %30 = arith.cmpi eq, %28, %29 : vector<8x16xi32>
    %cst_10 = arith.constant 0.000000e+00 : f32
    %31 = vector.broadcast %cst_10 : f32 to vector<8x16xf32>
    %32 = arith.select %30, %26, %31 : vector<8x16xi1>, vector<8x16xf32>
    %cst_11 = arith.constant dense<0.000000e+00> : vector<8xf32>
    %33 = vector.multi_reduction <add>, %32, %cst_11 [1] : vector<8x16xf32> to vector<8xf32>
    %34 = vector.shape_cast %33 : vector<8xf32> to vector<8x1xf32>
    %c0_12 = arith.constant 0 : index
    %c0_13 = arith.constant 0 : index
    %35 = vector.load %arg3[%c0_12, %c0_13] : memref<8x1xf32, #tpu.memory_space<vmem>>, vector<8x1xf32>
    tpu.vector_store %arg3[%c0_12, %c0_13], %34 {strides = array<i32>} : memref<8x1xf32, #tpu.memory_space<vmem>>, vector<8x1xf32>,
    %cst_14 = arith.constant 0.000000e+00 : f32
    %36 = vector.broadcast %cst_14 : f32 to vector<8x16xf32>
    %37 = arith.select %30, %36, %25 : vector<8x16xi1>, vector<8x16xf32>
    %cst_15 = arith.constant dense<0xFF800000> : vector<8xf32>
    %38 = vector.multi_reduction <maximumf>, %37, %cst_15 [1] : vector<8x16xf32> to vector<8xf32>
    %39 = vector.shape_cast %38 : vector<8xf32> to vector<8x1xf32>
    %c0_16 = arith.constant 0 : index
    %c0_17 = arith.constant 0 : index
    %40 = vector.load %arg4[%c0_16, %c0_17] : memref<8x1xf32, #tpu.memory_space<vmem>>, vector<8x1xf32>
    tpu.vector_store %arg4[%c0_16, %c0_17], %39 {strides = array<i32>} : memref<8x1xf32, #tpu.memory_space<vmem>>, vector<8x1xf32>,
    return
  }
  func.func @transform_0(%arg0: i32) -> (i32, i32) {
    %c0_i32 = arith.constant 0 : i32
    %c0_i32_0 = arith.constant 0 : i32
    return %arg0, %c0_i32 : i32, i32
  }
  func.func @transform_1(%arg0: i32) -> (i32, i32) {
    %c0_i32 = arith.constant 0 : i32
    %c0_i32_0 = arith.constant 0 : i32
    return %arg0, %c0_i32 : i32, i32
  }
  func.func @transform_2(%arg0: i32) -> (i32, i32) {
    %c0_i32 = arith.constant 0 : i32
    %c0_i32_0 = arith.constant 0 : i32
    return %arg0, %c0_i32 : i32, i32
  }
  func.func @transform_3(%arg0: i32) -> (i32, i32) {
    %c0_i32 = arith.constant 0 : i32
    %c0_i32_0 = arith.constant 0 : i32
    return %arg0, %c0_i32 : i32, i32
  }
}

</mosaic_0001>

<bundles_post_ra>
// kernel: tpu_custom_call.1
= control target key start
LH: loop header
LB: loop body
LE: loop exit
PB: predicated region body
PF: predicated region fallthrough
CT: control target
= control target key end

     0   :  { %v89_v1 = vmov 0   ;;  %s90_s14 = smov 112   ;;  %v52_v23 = vlaneseq  ;;  %vm59_vm6 = vcmask 130048   ;;  %vm63_vm7 = vcmask 7168   ;;  %s123_s0 = inlined_call_operand.vmem [shape: f32[8,32], index: 0, kind: input, shape index: {}]   ;;  %s124_s1 = inlined_call_operand.vmem [shape: s32[8,1], index: 1, kind: input, shape index: {}]   ;;  %s125_s2 = inlined_call_operand.vmem [shape: f32[8,1], index: 2, kind: output, shape index: {0}]   ;;  %s126_s3 = inlined_call_operand.vmem [shape: f32[8,1], index: 3, kind: output, shape index: {1}]  }
   0x1   :  { %v13_v0 = vld [vmem:[%s123_s0] sm:$0xff]  ;;  %80 = vset.pattern.permute.xlu0 %v89_v1 }
   0x2   :  { %15 = vrot.lane.b32.xlu0 %v13_v0, %s90_s14  ;;  %v51_v2 = vld [vmem:[%s124_s1] sm:$0xff]  ;;  %v53_v25 = vand.u32 127, %v52_v23 }
   0xa   :  { %55 = vperm.xlu0 %80, %v51_v2  }
  0x74   :  { %v16_v3 = vpop.permute.xlu0 %15 }
  0x75   :  { %v18_v4 = vsub.f32 %v13_v0, %v16_v3 }
  0x77   :  { %v19_v5 = vand.u32 2147483647, %v18_v4  ;;  %vm48_vm5 = vcmp.ge.f32.partialorder %v18_v4, 0.0 }
  0x79   :  { %v20_v6 = vsub.f32 0.0, %v19_v5 }
  0x7b   :  { %v21_v7 = vmul.f32 1.442695, %v20_v6 }
  0x7c   :  { %v56_v28 = vpop.permute.xlu0 %55 }
  0x7d   :  { %81 = vpow2.f32 %v21_v7  ;;  %vm57_vm4 = vcmp.eq.s32.totalorder %v53_v25, %v56_v28 }
  0x83   :  { %v82_v8 = vpop.eup %81 }
  0x84   :  { %v23_v9 = vadd.f32 1.0, %v82_v8 }
  0x86   :  { %83 = vrcp.f32 %v23_v9  ;;  %v35_v13 = vand.u32 2147483648, %v23_v9  ;;  %v33_v15 = vand.u32 2147483647, %v23_v9  ;;  %vm29_vm1 = vweird.f32 %v23_v9 }
  0x88   :  { %v36_v17 = vor.u32 1.1754944e-38, %v35_v13  ;;  %vm34_vm3 = vcmp.eq.f32.partialorder %v33_v15, 8.507059e+37 }
  0x8c   :  { %v84_v10 = vpop.eup %83 }
  0x8d   :  { %v25_v11 = vmul.f32 %v84_v10, %v23_v9  ;;  %vm30_vm0 = vweird.f32 %v84_v10 }
  0x8e   :  { %vm31_vm2 = vmor %vm29_vm1, %vm30_vm0 }
  0x8f   :  { %v26_v12 = vsub.f32 1.0, %v25_v11 }
  0x91   :  { %v27_v14 = vmul.f32 %v84_v10, %v26_v12 }
  0x93   :  { %v28_v16 = vadd.f32 %v84_v10, %v27_v14 }
  0x95   :  { %v32_v18 = vsel %vm31_vm2, %v84_v10, %v28_v16 }
  0x96   :  { %v37_v19 = vsel %vm34_vm3, %v36_v17, %v32_v18 }
  0x97   :  { %v39_v20 = vmul.f32 %v82_v8, %v37_v19  ;;  %v40_v21 = vadd.f32 1e-08, %v37_v19 }
  0x99   :  { %85 = vlog2.f32 %v40_v21  ;;  %v44_v22 = vadd.f32 1e-08, %v39_v20 }
  0x9b   :  { %87 = vlog2.f32 %v44_v22 }
  0x9f   :  { %v86_v24 = vpop.eup %85 }
  0xa0   :  { %v42_v26 = vmul.f32 0.6931472, %v86_v24 }
  0xa1   :  { %v88_v27 = vpop.eup %87 }
  0xa2   :  { %v46_v29 = vmul.f32 0.6931472, %v88_v27  ;;  %v43_v30 = vsub.f32 0.0, %v42_v26 }
  0xa4   :  { %v47_v31 = vsub.f32 0.0, %v46_v29 }
  0xa6   :  { %v50_v32 = vsel %vm48_vm5, %v47_v31, %v43_v30  ;;  %v49_v35 = vsel %vm48_vm5, %v43_v30, %v47_v31 }
  0xa7   :  { %v58_v33 = vsel %vm57_vm4, %v50_v32, 0.0  ;;  %v65_v36 = vsel %vm57_vm4, 0.0, %v49_v35 }
  0xa8   :  { %v60_v34 = vsel %vm59_vm6, %v58_v33, 0.0  ;;  %v66_v37 = vsel %vm59_vm6, %v65_v36, -inf }
  0xa9   :  { %61 = vadd.xlane.f32.xlu1 %v60_v34 }
  0xb1   :  { %67 = vmax.xlane.f32.xlu1 %v66_v37 }
 0x11c   :  { %v62_v38 = vpop.xlane.xlu1 %61 }
 0x11d   :  { %64 = vst.msk [vmem:[%s125_s2] sm:$0xff] %vm63_vm7, %v62_v38 }
 0x124   :  { %v68_v39 = vpop.xlane.xlu1 %67 }
 0x125   :  { %69 = vst.msk [vmem:[%s126_s3] sm:$0xff] %vm63_vm7, %v68_v39 }

</bundles_post_ra>
